<compile_context>
chip_gen: v5e
topology: v5e:2x2
jax: 0.10.0
libtpu: 0.0.40
codegen_flags: <defaults>
</compile_context>

<pallas_src>
import functools
import math

import jax
import jax.numpy as jnp
from jax.experimental import pallas as pl
from jax.experimental.pallas import tpu as pltpu


def _round_up(n, m):
    return ((n + m - 1) // m) * m


def actor_critic_kernel(x_ref, w1_ref, b1_ref, w2_ref, b2_ref, out_ref, *,
                        n_actions, batch, block_b):
    # Zero the tail rows of a ragged last block so downstream exp() stays finite.
    i = pl.program_id(0)
    row = jax.lax.broadcasted_iota(jnp.int32, x_ref.shape, 0)
    row_valid = (row + i * block_b) < batch
    x = jnp.where(row_valid, x_ref[...], 0.0)

    # Fused hidden layer: [actor_hidden | critic_hidden] in one MXU pass.
    h = jnp.dot(x, w1_ref[...], preferred_element_type=jnp.float32) + b1_ref[...]
    h = jnp.maximum(h, 0.0)

    # Fused output layer (block-diagonal):
    #   cols [0:n_actions] = actor logits, col n_actions = critic value, rest 0.
    y = jnp.dot(h, w2_ref[...], preferred_element_type=jnp.float32) + b2_ref[...]

    lane = jax.lax.broadcasted_iota(jnp.int32, y.shape, 1)
    is_actor = lane < n_actions
    is_value = lane == n_actions

    # Numerically-stable masked softmax over the actor lanes only.
    masked_logits = jnp.where(is_actor, y, -jnp.inf)
    m = jnp.max(masked_logits, axis=1, keepdims=True)
    e = jnp.exp(masked_logits - m)            # exp(-inf) = 0 on non-actor lanes
    denom = jnp.sum(e, axis=1, keepdims=True)
    probs = e / denom                         # exact divide: kernel is DMA-bound

    # Single narrow, contiguous store: probs on actor lanes, value on lane A.
    out_ref[...] = jnp.where(is_value, y, probs)


def fuse_params(params, n_actions):
    """Pack the 4 Linear layers into one hidden matmul + one block-diag output
    matmul.  Call ONCE at init (hot path only sees the packed arrays)."""
    aw1, ab1 = params["aw1"], params["ab1"]   # (S, H), (1, H)
    cw1, cb1 = params["cw1"], params["cb1"]   # (S, H), (1, H)
    aw2, ab2 = params["aw2"], params["ab2"]   # (H, A), (1, A)
    cw2, cb2 = params["cw2"], params["cb2"]   # (H, 1), (1, 1)
    H = aw1.shape[1]
    A = n_actions
    out_w = _round_up(A + 1, 8)               # narrow output width (>= A + 1)

    w1 = jnp.concatenate([aw1, cw1], axis=1)  # (S, 2H)
    b1 = jnp.concatenate([ab1, cb1], axis=1)  # (1, 2H)

    w2 = jnp.zeros((2 * H, out_w), jnp.float32)
    w2 = w2.at[:H, :A].set(aw2)
    w2 = w2.at[H:, A:A + 1].set(cw2)          # (2H, out_w)
    b2 = jnp.zeros((1, out_w), jnp.float32)
    b2 = b2.at[:, :A].set(ab2)
    b2 = b2.at[:, A:A + 1].set(cb2)           # (1, out_w)
    return w1, b1, w2, b2


def actor_critic_forward(x, packed, n_actions, block_b=4096):
    """x: (B, n_states) f32. packed = fuse_params(...) (done once at init).
    Returns (probs (B, n_actions), value (B, 1))."""
    w1, b1, w2, b2 = packed
    B, n_states = x.shape
    H2 = w1.shape[1]
    out_w = w2.shape[1]

    # Batch tile: as large as sensible (memory/overhead bound), but keep >= 2
    # grid steps when B allows so both v7x TensorCores get work.
    tb = min(block_b, max(8, _round_up(-(-B // 2), 8)))
    grid = (pl.cdiv(B, tb),)

    flops = 2 * B * (n_states * H2 + H2 * out_w)
    bytes_accessed = 4 * (B * n_states + w1.size + b1.size + w2.size + b2.size
                          + B * out_w)
    cost = pl.CostEstimate(flops=flops, transcendentals=B * out_w,
                           bytes_accessed=bytes_accessed)

    # Only raise the scoped-VMEM limit when the tile actually needs it
    # (lane-padded, double-buffered x and out blocks + resident weights).
    lanes = lambda n: _round_up(n, 128)
    vmem_needed = (2 * tb * (lanes(n_states) + lanes(out_w)) * 4
                   + 2 * 4 * (w1.size + b1.size + w2.size + b2.size)
                   + (4 << 20))
    cp_kwargs = dict(dimension_semantics=("parallel",))
    if vmem_needed > (16 << 20):
        cp_kwargs["vmem_limit_bytes"] = min(vmem_needed, 64 << 20)

    out = pl.pallas_call(
        functools.partial(actor_critic_kernel, n_actions=n_actions,
                          batch=B, block_b=tb),
        out_shape=jax.ShapeDtypeStruct((B, out_w), jnp.float32),
        grid=grid,
        in_specs=[
            pl.BlockSpec((tb, n_states), lambda i: (i, 0)),   # x: streams over batch
            pl.BlockSpec((n_states, H2), lambda i: (0, 0)),   # w1: resident
            pl.BlockSpec((1, H2), lambda i: (0, 0)),          # b1: resident
            pl.BlockSpec((H2, out_w), lambda i: (0, 0)),      # w2: resident
            pl.BlockSpec((1, out_w), lambda i: (0, 0)),       # b2: resident
        ],
        out_specs=pl.BlockSpec((tb, out_w), lambda i: (i, 0)),
        compiler_params=pltpu.CompilerParams(**cp_kwargs),
        cost_estimate=cost,
    )(x, w1, b1, w2, b2)

    probs = out[:, :n_actions]
    value = out[:, n_actions:n_actions + 1]
    return probs, value


def init_linear(key, in_features, out_features):
    """Deterministic init mimicking torch.nn.Linear defaults
    (uniform +/- 1/sqrt(fan_in)); weight in (in, out) layout, bias (1, out)."""
    kw, kb = jax.random.split(key)
    bound = 1.0 / math.sqrt(in_features)
    w = jax.random.uniform(kw, (in_features, out_features), jnp.float32, -bound, bound)
    b = jax.random.uniform(kb, (1, out_features), jnp.float32, -bound, bound)
    return w, b


if __name__ == "__main__":
    # Small shapes consistent with the module's forward.
    batch = 8
    n_states = 16
    n_actions = 4
    hidden_dim = 32

    key = jax.random.PRNGKey(0)
    k_x, k_c1, k_c2, k_a1, k_a2 = jax.random.split(key, 5)

    x = jax.random.normal(k_x, (batch, n_states), jnp.float32)

    cw1, cb1 = init_linear(k_c1, n_states, hidden_dim)
    cw2, cb2 = init_linear(k_c2, hidden_dim, 1)
    aw1, ab1 = init_linear(k_a1, n_states, hidden_dim)
    aw2, ab2 = init_linear(k_a2, hidden_dim, n_actions)

    params = dict(cw1=cw1, cb1=cb1, cw2=cw2, cb2=cb2,
                  aw1=aw1, ab1=ab1, aw2=aw2, ab2=ab2)

    # Pack ONCE at init (hoisted out of the per-call forward path).
    packed = jax.block_until_ready(fuse_params(params, n_actions))

    probs, value = actor_critic_forward(x, packed, n_actions)
    jax.block_until_ready((probs, value))

    # Sanity checks against an unfused pure-JAX reference of the PyTorch module.
    h_c = jnp.maximum(x @ cw1 + cb1, 0.0)
    value_ref = h_c @ cw2 + cb2
    h_a = jnp.maximum(x @ aw1 + ab1, 0.0)
    logits = h_a @ aw2 + ab2
    probs_ref = jax.nn.softmax(logits, axis=1)

    assert probs.shape == (batch, n_actions) and value.shape == (batch, 1)
    assert jnp.allclose(value, value_ref, atol=1e-5), "value mismatch"
    assert jnp.allclose(probs, probs_ref, atol=1e-5), "probs mismatch"
    assert jnp.allclose(jnp.sum(probs, axis=1), 1.0, atol=1e-5), "probs not normalized"

    print("KERNEL_OK")
</pallas_src>

<mosaic_0001>
module attributes {stable_mosaic.version = 11 : i64} {
  func.func @actor_critic_kernel(%arg0: i32, %arg1: memref<8x16xf32, #tpu.memory_space<vmem>>, %arg2: memref<16x64xf32, #tpu.memory_space<vmem>>, %arg3: memref<1x64xf32, #tpu.memory_space<vmem>>, %arg4: memref<64x8xf32, #tpu.memory_space<vmem>>, %arg5: memref<1x8xf32, #tpu.memory_space<vmem>>, %arg6: memref<8x8xf32, #tpu.memory_space<vmem>>) attributes {dimension_semantics = [#tpu.dimension_semantics<parallel>], iteration_bounds = array<i64: 1>, scalar_prefetch = 0 : i64, scratch_operands = 0 : i64, tpu.core_type = #tpu.core_type<tc>, window_params = [{transform_indices = @transform_0, window_bounds = array<i64: 8, 16>}, {pipeline_mode = #tpu.pipeline_mode<synchronous>, transform_indices = @transform_1, window_bounds = array<i64: 16, 64>}, {pipeline_mode = #tpu.pipeline_mode<synchronous>, transform_indices = @transform_2, window_bounds = array<i64: 1, 64>}, {pipeline_mode = #tpu.pipeline_mode<synchronous>, transform_indices = @transform_3, window_bounds = array<i64: 64, 8>}, {pipeline_mode = #tpu.pipeline_mode<synchronous>, transform_indices = @transform_4, window_bounds = array<i64: 1, 8>}, {transform_indices = @transform_5, window_bounds = array<i64: 8, 8>}]} {
    %0 = tpu.iota {dimensions = array<i32: 0>} : vector<8x16xi32>
    %c8_i32 = arith.constant 8 : i32
    %1 = arith.muli %arg0, %c8_i32 : i32
    %2 = vector.broadcast %1 : i32 to vector<8x16xi32>
    %3 = arith.addi %0, %2 : vector<8x16xi32>
    %c8_i32_0 = arith.constant 8 : i32
    %4 = vector.broadcast %c8_i32_0 : i32 to vector<8x16xi32>
    %5 = arith.cmpi slt, %3, %4 : vector<8x16xi32>
    %c0 = arith.constant 0 : index
    %c0_1 = arith.constant 0 : index
    %6 = vector.load %arg1[%c0, %c0_1] : memref<8x16xf32, #tpu.memory_space<vmem>>, vector<8x16xf32>
    %cst = arith.constant 0.000000e+00 : f32
    %7 = vector.broadcast %cst : f32 to vector<8x16xf32>
    %8 = arith.select %5, %6, %7 : vector<8x16xi1>, vector<8x16xf32>
    %c0_2 = arith.constant 0 : index
    %c0_3 = arith.constant 0 : index
    %9 = vector.load %arg2[%c0_2, %c0_3] : memref<16x64xf32, #tpu.memory_space<vmem>>, vector<16x64xf32>
    %cst_4 = arith.constant dense<0.000000e+00> : vector<8x64xf32>
    %10 = tpu.matmul %8, %9, %cst_4 {dimension_numbers = #tpu.dot_dimension_numbers<[1], [0], [0], [1], [0, 0, 1, 1], [], []>} : vector<8x16xf32>, vector<16x64xf32>, vector<8x64xf32> -> vector<8x64xf32>
    %c0_5 = arith.constant 0 : index
    %c0_6 = arith.constant 0 : index
    %11 = vector.load %arg3[%c0_5, %c0_6] : memref<1x64xf32, #tpu.memory_space<vmem>>, vector<1x64xf32>
    %12 = vector.broadcast %11 : vector<1x64xf32> to vector<8x64xf32>
    %13 = arith.addf %10, %12 : vector<8x64xf32>
    %cst_7 = arith.constant 0.000000e+00 : f32
    %14 = vector.broadcast %cst_7 : f32 to vector<8x64xf32>
    %15 = arith.maximumf %13, %14 : vector<8x64xf32>
    %c0_8 = arith.constant 0 : index
    %c0_9 = arith.constant 0 : index
    %16 = vector.load %arg4[%c0_8, %c0_9] : memref<64x8xf32, #tpu.memory_space<vmem>>, vector<64x8xf32>
    %cst_10 = arith.constant dense<0.000000e+00> : vector<8x8xf32>
    %17 = tpu.matmul %15, %16, %cst_10 {dimension_numbers = #tpu.dot_dimension_numbers<[1], [0], [0], [1], [0, 0, 1, 1], [], []>} : vector<8x64xf32>, vector<64x8xf32>, vector<8x8xf32> -> vector<8x8xf32>
    %c0_11 = arith.constant 0 : index
    %c0_12 = arith.constant 0 : index
    %18 = vector.load %arg5[%c0_11, %c0_12] : memref<1x8xf32, #tpu.memory_space<vmem>>, vector<1x8xf32>
    %19 = vector.broadcast %18 : vector<1x8xf32> to vector<8x8xf32>
    %20 = arith.addf %17, %19 : vector<8x8xf32>
    %21 = tpu.iota {dimensions = array<i32: 1>} : vector<8x8xi32>
    %c4_i32 = arith.constant 4 : i32
    %22 = vector.broadcast %c4_i32 : i32 to vector<8x8xi32>
    %23 = arith.cmpi slt, %21, %22 : vector<8x8xi32>
    %c4_i32_13 = arith.constant 4 : i32
    %24 = vector.broadcast %c4_i32_13 : i32 to vector<8x8xi32>
    %25 = arith.cmpi eq, %21, %24 : vector<8x8xi32>
    %cst_14 = arith.constant 0xFF800000 : f32
    %26 = vector.broadcast %cst_14 : f32 to vector<8x8xf32>
    %27 = arith.select %23, %20, %26 : vector<8x8xi1>, vector<8x8xf32>
    %cst_15 = arith.constant dense<0xFF800000> : vector<8xf32>
    %28 = vector.multi_reduction <maximumf>, %27, %cst_15 [1] : vector<8x8xf32> to vector<8xf32>
    %29 = vector.shape_cast %28 : vector<8xf32> to vector<8x1xf32>
    %30 = vector.broadcast %29 : vector<8x1xf32> to vector<8x8xf32>
    %31 = arith.subf %27, %30 : vector<8x8xf32>
    %32 = math.exp %31 : vector<8x8xf32>
    %cst_16 = arith.constant dense<0.000000e+00> : vector<8xf32>
    %33 = vector.multi_reduction <add>, %32, %cst_16 [1] : vector<8x8xf32> to vector<8xf32>
    %34 = vector.shape_cast %33 : vector<8xf32> to vector<8x1xf32>
    %35 = vector.broadcast %34 : vector<8x1xf32> to vector<8x8xf32>
    %36 = arith.divf %32, %35 : vector<8x8xf32>
    %37 = arith.select %25, %20, %36 : vector<8x8xi1>, vector<8x8xf32>
    %c0_17 = arith.constant 0 : index
    %c0_18 = arith.constant 0 : index
    %38 = vector.load %arg6[%c0_17, %c0_18] : memref<8x8xf32, #tpu.memory_space<vmem>>, vector<8x8xf32>
    tpu.vector_store %arg6[%c0_17, %c0_18], %37 {strides = array<i32>} : memref<8x8xf32, #tpu.memory_space<vmem>>, vector<8x8xf32>,
    return
  }
  func.func @transform_0(%arg0: i32) -> (i32, i32) {
    %c0_i32 = arith.constant 0 : i32
    %c0_i32_0 = arith.constant 0 : i32
    return %arg0, %c0_i32 : i32, i32
  }
  func.func @transform_1(%arg0: i32) -> (i32, i32) {
    %c0_i32 = arith.constant 0 : i32
    %c0_i32_0 = arith.constant 0 : i32
    %c0_i32_1 = arith.constant 0 : i32
    return %c0_i32, %c0_i32_0 : i32, i32
  }
  func.func @transform_2(%arg0: i32) -> (i32, i32) {
    %c0_i32 = arith.constant 0 : i32
    %c0_i32_0 = arith.constant 0 : i32
    %c0_i32_1 = arith.constant 0 : i32
    return %c0_i32, %c0_i32_0 : i32, i32
  }
  func.func @transform_3(%arg0: i32) -> (i32, i32) {
    %c0_i32 = arith.constant 0 : i32
    %c0_i32_0 = arith.constant 0 : i32
    %c0_i32_1 = arith.constant 0 : i32
    return %c0_i32, %c0_i32_0 : i32, i32
  }
  func.func @transform_4(%arg0: i32) -> (i32, i32) {
    %c0_i32 = arith.constant 0 : i32
    %c0_i32_0 = arith.constant 0 : i32
    %c0_i32_1 = arith.constant 0 : i32
    return %c0_i32, %c0_i32_0 : i32, i32
  }
  func.func @transform_5(%arg0: i32) -> (i32, i32) {
    %c0_i32 = arith.constant 0 : i32
    %c0_i32_0 = arith.constant 0 : i32
    return %arg0, %c0_i32 : i32, i32
  }
}

</mosaic_0001>

<bundles_post_ra>
// kernel: tpu_custom_call.1
= control target key start
LH: loop header
LB: loop body
LE: loop exit
PB: predicated region body
PF: predicated region fallthrough
CT: control target
= control target key end

     0   :  { %vm35_vm0 = vcmask 130048   ;;  %s255_s0 = inlined_call_operand.vmem [shape: f32[8,16], index: 0, kind: input, shape index: {}]   ;;  %s256_s1 = inlined_call_operand.vmem [shape: f32[16,64], index: 1, kind: input, shape index: {}]   ;;  %s257_s2 = inlined_call_operand.vmem [shape: f32[1,64], index: 2, kind: input, shape index: {}]   ;;  %s258_s3 = inlined_call_operand.vmem [shape: f32[64,8], index: 3, kind: input, shape index: {}]   ;;  %s259_s4 = inlined_call_operand.vmem [shape: f32[1,8], index: 4, kind: input, shape index: {}]   ;;  %s260_s5 = inlined_call_operand.hbm [shape: f32[8,8], index: 5, kind: output, shape index: {}]  }
   0x1   :  { %v30_v0 = vld [vmem:[%s256_s1 + $0x8] sm:$0xff]  ;;  %v29_v1 = vld [vmem:[%s256_s1] sm:$0xff]  ;;  %v67_v3 = vld [vmem:[%s258_s3 + $0x38] sm:$0xff] }
   0x2   :  { %53 = vmatpush.msra.mxu0 %v30_v0  ;;  %v27_v2 = vld [vmem:[%s255_s0] sm:$0xff]  ;;  %v66_v4 = vld [vmem:[%s258_s3 + $0x30] sm:$0xff]  ;;  %84 = vmatpush.msra.mxu1 %v67_v3  ;;  %v65_v5 = vld [vmem:[%s258_s3 + $0x28] sm:$0xff] }
   0x4   :  { %54 = vmatpush.msra.mxu0 %v29_v1 }
   0x5   :  { %10 = vsyncpa [#allocation3], 0  ;;  %144 = vmatmul.msk.f32.vlgmr.msra.gmra.mxu0 %vm35_vm0, %v27_v2  ;;  %85 = vmatpush.msra.mxu1 %v66_v4  ;;  %v64_v6 = vld [vmem:[%s258_s3 + $0x20] sm:$0xff]  ;;  %v63_v7 = vld [vmem:[%s258_s3 + $0x18] sm:$0xff]  ;;  %vm72_vm1 = vcmask 523264   ;;  %v96_v15 = vlaneseq  ;;  %vm101_vm3 = vcmask 64512  }
   0x6   :  { %v62_v8 = vld [vmem:[%s258_s3 + $0x10] sm:$0xff]  ;;  %v61_v9 = vld [vmem:[%s258_s3 + $0x8] sm:$0xff]  ;;  %v60_v10 = vld [vmem:[%s258_s3] sm:$0xff]  ;;  %s135_s18 = sshll.u32 %s260_s5, 4  ;;  %s136_s18 = int_to_ptr.hbm [resolvable:$true] %s135_s18 }
   0x7   :  { %86 = vmatpush.msra.mxu1 %v65_v5  ;;  %v147_v11 = vld [vmem:[%s257_s2] ss:$0 sm:$0xff]  ;;  %v97_v16 = vand.u32 127, %v96_v15  ;;  %s179_s2 = smov [#allocation2]  }
   0x8   :  { %v148_v17 = vld [vmem:[%s259_s4] ss:$0 sm:$0xff]  ;;  %s133_s3 = sshll.u32 %s179_s2, 4  ;;  %s134_s3 = int_to_ptr.vmem [resolvable:$true] %s133_s3 }
   0x9   :  { %87 = vmatpush.msra.mxu1 %v64_v6  ;;  %vm98_vm2 = vcmp.lt.s32.totalorder %v97_v16, 4  ;;  %vm99_vm8 = vcmp.eq.s32.totalorder %v97_v16, 4 }
   0xb   :  { %88 = vmatpush.msra.mxu1 %v63_v7 }
   0xd   :  { %89 = vmatpush.msra.mxu1 %v62_v8 }
   0xf   :  { %90 = vmatpush.msra.mxu1 %v61_v9 }
  0x11   :  { %91 = vmatpush.msra.mxu1 %v60_v10 }
  0x82   :  { %v56_v12 = vpop.f32.mrf.mxu0 }
  0x83   :  { %v57_v13 = vadd.f32 %v147_v11, %v56_v12 }
  0x85   :  { %v59_v14 = vmax.f32 %v57_v13, 0.0 }
  0x87   :  { %145 = vmatmul.msk.f32.vlgmr.msra.gmra.mxu1 %vm72_vm1, %v59_v14 }
 0x104   :  { %v93_v18 = vpop.f32.mrf.mxu1 }
 0x105   :  { %v94_v19 = vadd.f32 %v148_v17, %v93_v18 }
 0x107   :  { %v100_v20 = vsel %vm98_vm2, %v94_v19, -inf }
 0x108   :  { %v102_v21 = vsel %vm101_vm3, %v100_v20, -inf }
 0x109   :  { %103 = vmax.xlane.f32.xlu0 %v102_v21 }
 0x17c   :  { %v104_v22 = vpop.xlane.xlu0 %103 }
 0x17d   :  { %v105_v23 = vsub.f32 %v100_v20, %v104_v22 }
 0x17f   :  { %v106_v24 = vmul.f32 1.442695, %v105_v23 }
 0x181   :  { %149 = vpow2.f32 %v106_v24 }
 0x187   :  { %v150_v25 = vpop.eup %149 }
 0x188   :  { %v108_v26 = vsel %vm101_vm3, %v150_v25, 0.0 }
 0x189   :  { %109 = vadd.xlane.f32.xlu0 %v108_v26 }
 0x1fc   :  { %v110_v27 = vpop.xlane.xlu0 %109 }
 0x1fd   :  { %151 = vrcp.f32 %v110_v27  ;;  %v122_v31 = vand.u32 2147483648, %v110_v27  ;;  %v120_v33 = vand.u32 2147483647, %v110_v27  ;;  %vm116_vm5 = vweird.f32 %v110_v27 }
 0x1ff   :  { %v123_v35 = vor.u32 1.1754944e-38, %v122_v31  ;;  %vm121_vm7 = vcmp.eq.f32.partialorder %v120_v33, 8.507059e+37 }
 0x203   :  { %v152_v28 = vpop.eup %151 }
 0x204   :  { %v112_v29 = vmul.f32 %v152_v28, %v110_v27  ;;  %vm117_vm4 = vweird.f32 %v152_v28 }
 0x205   :  { %vm118_vm6 = vmor %vm116_vm5, %vm117_vm4 }
 0x206   :  { %v113_v30 = vsub.f32 1.0, %v112_v29 }
 0x208   :  { %v114_v32 = vmul.f32 %v152_v28, %v113_v30 }
 0x20a   :  { %v115_v34 = vadd.f32 %v152_v28, %v114_v32 }
 0x20c   :  { %v119_v36 = vsel %vm118_vm6, %v152_v28, %v115_v34 }
 0x20d   :  { %v124_v37 = vsel %vm121_vm7, %v123_v35, %v119_v36 }
 0x20e   :  { %v125_v38 = vmul.f32 %v150_v25, %v124_v37 }
 0x210   :  { %v126_v39 = vsel %vm99_vm8, %v94_v19, %v125_v38 }
 0x211   :  { %127 = vst.msk [vmem:[#allocation2] sm:$0xff] %vm101_vm3, %v126_v39 }
 0x212   :  { %138 = dma.vmem_to_hbm [thread:$0]  %s134_s3, 128, %s136_s18, [#allocation3]  }
 0x213   :  { %177 = dma.done.wait [#allocation3], 128  }
 0x214   :  { %178 = vsyncadd [#allocation3], 4294967168 }
 0x215   :  { %143 = vsyncpa [#allocation3], 1 }

</bundles_post_ra>
